<compile_context>
chip_gen: v5e
topology: v5e:2x2
jax: 0.10.0
libtpu: 0.0.40
codegen_flags: <defaults>
</compile_context>

<pallas_src>
from functools import partial

import jax
import jax.numpy as jnp
from jax.experimental import pallas as pl
from jax.experimental.pallas import tpu as pltpu

HIDDEN = 128


def _round_up(n, m):
    return (n + m - 1) // m * m


def _pick_tile_b(batch, dim_in, itemsize, target_bytes=4 << 20, max_tile=8192):
    """Bytes-sized batch tile (multiple of 128), with enough tiles for both v7x cores."""
    if batch < 128:
        # Tiny batches: a single (partial) tile; lane-density / overhead are irrelevant here.
        return batch
    tile = target_bytes // max(1, dim_in * itemsize)      # ~target_bytes of x per grid step
    tile = min(tile, max_tile, batch)
    if batch >= 2 * 128:
        # v7x has 2 TensorCores: keep >= 2 batch tiles so ("parallel",) can use both.
        tile = min(tile, _round_up(pl.cdiv(batch, 2), 128))
    return max(128, (tile // 128) * 128)


def _critic_kernel(x_ref, w1_ref, b1_ref, w2_ref, b2_ref, w3_ref, b3_ref, out_ref):
    """One (tile_b, dim_in) batch tile through all three layers.

    MXU matmuls accumulate in f32; x is cast to the weight dtype in-register (the VPU cast
    hides under the x DMA), so the wrapper never rewrites x in HBM.
    """
    # Layer 1: (tile_b, dim_in) @ (dim_in, 128) on the MXU.
    x = x_ref[...].astype(w1_ref.dtype)
    h1 = jnp.dot(x, w1_ref[...], preferred_element_type=jnp.float32)
    h1 = jnp.maximum(h1 + b1_ref[...], 0.0)

    # Layer 2: (tile_b, 128) @ (128, 128) on the MXU.
    h2 = jnp.dot(h1.astype(w2_ref.dtype), w2_ref[...], preferred_element_type=jnp.float32)
    h2 = jnp.maximum(h2 + b2_ref[...], 0.0)

    # Output head (out_features == 1): w3_row (1,128) contracted against h2 (tile_b,128) on
    # its last dim (A @ B^T form) -> (1, tile_b) with batch on lanes, i.e. the lane-dense row
    # this block's output expects. Scalar bias read from SMEM.
    row = jax.lax.dot_general(
        w3_ref[...], h2,
        dimension_numbers=(((1,), (1,)), ((), ())),
        preferred_element_type=jnp.float32)                      # (1, tile_b)
    out_ref[0] = (row + b3_ref[0, 0]).astype(out_ref.dtype)      # (1, tile_b) row store


@partial(jax.jit, static_argnames=("use_bf16",))
def critic_forward(x, w1, b1, w2, b2, w3, b3, *, use_bf16=True):
    """Fused Critic forward. use_bf16=True (default) runs the two 128-wide matmuls with bf16
    inputs / f32 accumulation (explicit opt-in); use_bf16=False keeps everything f32."""
    batch, dim_in = x.shape
    hidden = w1.shape[1]

    itemsize_x = jnp.dtype(x.dtype).itemsize
    tile_b = _pick_tile_b(batch, dim_in, itemsize_x)
    num_tiles = pl.cdiv(batch, tile_b)

    mxu_dtype = jnp.bfloat16 if use_bf16 else jnp.float32
    itemsize_w = jnp.dtype(mxu_dtype).itemsize

    # Weights are tiny and loaded once; casting them in the wrapper is a one-off cost.
    w1_c = w1.astype(mxu_dtype)
    w2_c = w2.astype(mxu_dtype)
    b1_c = b1.astype(jnp.float32).reshape(1, hidden)
    b2_c = b2.astype(jnp.float32).reshape(1, hidden)
    w3_row = w3.astype(jnp.float32).reshape(1, hidden)   # (128, 1) column -> (1, 128) row
    b3_c = b3.astype(jnp.float32).reshape(1, 1)

    # VMEM budget (double-buffered x/out tiles, double-buffered resident weights, live h1/h2
    # values plus slack), clamped to [16 MiB, 64 MiB] for v5e/v6e/v7x portability.
    vmem_bytes = (
        2 * tile_b * dim_in * itemsize_x                 # x tile (double-buffered)
        + 2 * tile_b * 4                                 # (1, tile_b) out row (double-buffered)
        + 2 * (dim_in * hidden + hidden * hidden) * itemsize_w   # w1, w2 (default 2 buffers)
        + 2 * (3 * hidden + 1) * 4                       # b1, b2, w3 row, b3
        + 3 * tile_b * hidden * 4                        # h1 / h2 + lowering slack
    )
    vmem_limit = int(min(max(vmem_bytes + (2 << 20), 16 << 20), 64 << 20))

    flops = 2 * batch * (dim_in * hidden + hidden * hidden + hidden)
    bytes_accessed = (
        batch * dim_in * itemsize_x
        + (dim_in * hidden + hidden * hidden) * itemsize_w
        + (3 * hidden + 1) * 4
        + num_tiles * tile_b * 4
    )

    out = pl.pallas_call(
        _critic_kernel,
        out_shape=jax.ShapeDtypeStruct((num_tiles, 1, tile_b), jnp.float32),
        grid=(num_tiles,),
        in_specs=[
            pl.BlockSpec((tile_b, dim_in), lambda i: (i, 0)),   # x: streamed per batch tile
            pl.BlockSpec((dim_in, hidden), lambda i: (0, 0)),   # w1: resident across grid
            pl.BlockSpec((1, hidden), lambda i: (0, 0)),        # b1: resident
            pl.BlockSpec((hidden, hidden), lambda i: (0, 0)),   # w2: resident
            pl.BlockSpec((1, hidden), lambda i: (0, 0)),        # b2: resident
            pl.BlockSpec((1, hidden), lambda i: (0, 0)),        # w3 row: resident
            pl.BlockSpec(memory_space=pltpu.MemorySpace.SMEM),  # b3: scalar in SMEM
        ],
        out_specs=pl.BlockSpec((1, 1, tile_b), lambda i: (i, 0, 0)),  # lane-dense rows
        compiler_params=pltpu.CompilerParams(
            dimension_semantics=("parallel",),   # v7x: shard batch tiles across both TCs
            vmem_limit_bytes=vmem_limit),
        cost_estimate=pl.CostEstimate(
            flops=flops, transcendentals=0, bytes_accessed=bytes_accessed),
    )(x, w1_c, b1_c, w2_c, b2_c, w3_row, b3_c)

    # (num_tiles, 1, tile_b) rows -> (batch, 1) column; padded tail rows are sliced off.
    return out.reshape(-1, 1)[:batch]


def init_critic_params(key, dim_in, hidden=HIDDEN, dtype=jnp.float32):
    """PyTorch nn.Linear-style init (U(-1/sqrt(fan_in), +)); weights stored (in, out)."""
    ks = jax.random.split(key, 6)

    def linear(kw, kb, fan_in, fan_out):
        bound = float(fan_in) ** -0.5
        w = jax.random.uniform(kw, (fan_in, fan_out), dtype, -bound, bound)
        b = jax.random.uniform(kb, (fan_out,), dtype, -bound, bound)
        return w, b

    w1, b1 = linear(ks[0], ks[1], dim_in, hidden)
    w2, b2 = linear(ks[2], ks[3], hidden, hidden)
    w3, b3 = linear(ks[4], ks[5], hidden, 1)
    return w1, b1, w2, b2, w3, b3


def critic_reference_f32(x, w1, b1, w2, b2, w3, b3):
    hp = jax.lax.Precision.HIGHEST
    h1 = jnp.maximum(jnp.dot(x, w1, precision=hp) + b1.reshape(1, -1), 0.0)
    h2 = jnp.maximum(jnp.dot(h1, w2, precision=hp) + b2.reshape(1, -1), 0.0)
    return jnp.dot(h2, w3.reshape(-1, 1), precision=hp) + b3.reshape(1, 1)


def critic_reference_mixed(x, w1, b1, w2, b2, w3, b3):
    """Same bf16-input / f32-accumulate arithmetic as the kernel's default path."""
    h1 = jnp.dot(x.astype(jnp.bfloat16), w1.astype(jnp.bfloat16),
                 preferred_element_type=jnp.float32)
    h1 = jnp.maximum(h1 + b1.reshape(1, -1), 0.0)
    h2 = jnp.dot(h1.astype(jnp.bfloat16), w2.astype(jnp.bfloat16),
                 preferred_element_type=jnp.float32)
    h2 = jnp.maximum(h2 + b2.reshape(1, -1), 0.0)
    return jnp.sum(h2 * w3.reshape(1, -1), axis=-1, keepdims=True) + b3.reshape(1, 1)


if __name__ == "__main__":
    key = jax.random.PRNGKey(0)
    k_x, k_x2, k_p = jax.random.split(key, 3)

    dim_in = 32
    params = init_critic_params(k_p, dim_in)

    # Small batch: single partial tile (lane-sparse path is fine at this size).
    x_small = jax.random.normal(k_x, (8, dim_in), dtype=jnp.float32)
    out_small = critic_forward(x_small, *params)
    jax.block_until_ready(out_small)
    assert out_small.shape == (8, 1), out_small.shape

    # Larger batch: multiple lane-dense 128-row tiles plus a ragged last tile.
    x_big = jax.random.normal(k_x2, (300, dim_in), dtype=jnp.float32)
    out_big = critic_forward(x_big, *params)
    jax.block_until_ready(out_big)
    assert out_big.shape == (300, 1), out_big.shape

    for x_t, out_t in ((x_small, out_small), (x_big, out_big)):
        ref_mixed = critic_reference_mixed(x_t, *params)
        ref_f32 = critic_reference_f32(x_t, *params)
        assert jnp.allclose(out_t, ref_mixed, atol=2e-3, rtol=2e-3), "mismatch vs matched-precision ref"
        assert jnp.allclose(out_t, ref_f32, atol=5e-2, rtol=5e-2), "mismatch vs f32 reference"

    # Full-f32 path (explicit opt-out of bf16) should match the f32 reference tightly.
    out_f32 = critic_forward(x_small, *params, use_bf16=False)
    jax.block_until_ready(out_f32)
    assert jnp.allclose(out_f32, critic_reference_f32(x_small, *params),
                        atol=1e-3, rtol=1e-3), "mismatch vs f32 reference (use_bf16=False)"

    print("KERNEL_OK")
</pallas_src>

<mosaic_0001>
module attributes {stable_mosaic.version = 11 : i64} {
  func.func @_critic_kernel(%arg0: i32, %arg1: memref<8x32xf32, #tpu.memory_space<vmem>>, %arg2: memref<32x128xbf16, #tpu.memory_space<vmem>>, %arg3: memref<1x128xf32, #tpu.memory_space<vmem>>, %arg4: memref<128x128xbf16, #tpu.memory_space<vmem>>, %arg5: memref<1x128xf32, #tpu.memory_space<vmem>>, %arg6: memref<1x128xf32, #tpu.memory_space<vmem>>, %arg7: memref<1x1xf32, #tpu.memory_space<smem>>, %arg8: memref<1x1x8xf32, #tpu.memory_space<vmem>>) attributes {dimension_semantics = [#tpu.dimension_semantics<parallel>], iteration_bounds = array<i64: 1>, scalar_prefetch = 0 : i64, scratch_operands = 0 : i64, tpu.core_type = #tpu.core_type<tc>, window_params = [{transform_indices = @transform_0, window_bounds = array<i64: 8, 32>}, {pipeline_mode = #tpu.pipeline_mode<synchronous>, transform_indices = @transform_1, window_bounds = array<i64: 32, 128>}, {pipeline_mode = #tpu.pipeline_mode<synchronous>, transform_indices = @transform_2, window_bounds = array<i64: 1, 128>}, {pipeline_mode = #tpu.pipeline_mode<synchronous>, transform_indices = @transform_3, window_bounds = array<i64: 128, 128>}, {pipeline_mode = #tpu.pipeline_mode<synchronous>, transform_indices = @transform_4, window_bounds = array<i64: 1, 128>}, {pipeline_mode = #tpu.pipeline_mode<synchronous>, transform_indices = @transform_5, window_bounds = array<i64: 1, 128>}, {transform_indices = @transform_6, window_bounds = array<i64: 1, 1>}, {transform_indices = @transform_7, window_bounds = array<i64: 1, 1, 8>}]} {
    %c0 = arith.constant 0 : index
    %c0_0 = arith.constant 0 : index
    %0 = vector.load %arg1[%c0, %c0_0] : memref<8x32xf32, #tpu.memory_space<vmem>>, vector<8x32xf32>
    %1 = arith.truncf %0 : vector<8x32xf32> to vector<8x32xbf16>
    %c0_1 = arith.constant 0 : index
    %c0_2 = arith.constant 0 : index
    %2 = vector.load %arg2[%c0_1, %c0_2] : memref<32x128xbf16, #tpu.memory_space<vmem>>, vector<32x128xbf16>
    %cst = arith.constant dense<0.000000e+00> : vector<8x128xf32>
    %3 = tpu.matmul %1, %2, %cst {dimension_numbers = #tpu.dot_dimension_numbers<[1], [0], [0], [1], [0, 0, 1, 1], [], []>} : vector<8x32xbf16>, vector<32x128xbf16>, vector<8x128xf32> -> vector<8x128xf32>
    %c0_3 = arith.constant 0 : index
    %c0_4 = arith.constant 0 : index
    %4 = vector.load %arg3[%c0_3, %c0_4] : memref<1x128xf32, #tpu.memory_space<vmem>>, vector<1x128xf32>
    %5 = vector.broadcast %4 : vector<1x128xf32> to vector<8x128xf32>
    %6 = arith.addf %3, %5 : vector<8x128xf32>
    %cst_5 = arith.constant 0.000000e+00 : f32
    %7 = vector.broadcast %cst_5 : f32 to vector<8x128xf32>
    %8 = arith.maximumf %6, %7 : vector<8x128xf32>
    %9 = arith.truncf %8 : vector<8x128xf32> to vector<8x128xbf16>
    %c0_6 = arith.constant 0 : index
    %c0_7 = arith.constant 0 : index
    %10 = vector.load %arg4[%c0_6, %c0_7] : memref<128x128xbf16, #tpu.memory_space<vmem>>, vector<128x128xbf16>
    %cst_8 = arith.constant dense<0.000000e+00> : vector<8x128xf32>
    %11 = tpu.matmul %9, %10, %cst_8 {dimension_numbers = #tpu.dot_dimension_numbers<[1], [0], [0], [1], [0, 0, 1, 1], [], []>} : vector<8x128xbf16>, vector<128x128xbf16>, vector<8x128xf32> -> vector<8x128xf32>
    %c0_9 = arith.constant 0 : index
    %c0_10 = arith.constant 0 : index
    %12 = vector.load %arg5[%c0_9, %c0_10] : memref<1x128xf32, #tpu.memory_space<vmem>>, vector<1x128xf32>
    %13 = vector.broadcast %12 : vector<1x128xf32> to vector<8x128xf32>
    %14 = arith.addf %11, %13 : vector<8x128xf32>
    %cst_11 = arith.constant 0.000000e+00 : f32
    %15 = vector.broadcast %cst_11 : f32 to vector<8x128xf32>
    %16 = arith.maximumf %14, %15 : vector<8x128xf32>
    %c0_12 = arith.constant 0 : index
    %c0_13 = arith.constant 0 : index
    %17 = vector.load %arg6[%c0_12, %c0_13] : memref<1x128xf32, #tpu.memory_space<vmem>>, vector<1x128xf32>
    %cst_14 = arith.constant dense<0.000000e+00> : vector<1x8xf32>
    %18 = tpu.matmul %17, %16, %cst_14 {dimension_numbers = #tpu.dot_dimension_numbers<[1], [1], [0], [0], [0, 0, 1, 0], [], []>} : vector<1x128xf32>, vector<8x128xf32>, vector<1x8xf32> -> vector<1x8xf32>
    %c0_15 = arith.constant 0 : index
    %c0_16 = arith.constant 0 : index
    %19 = memref.load %arg7[%c0_15, %c0_16] : memref<1x1xf32, #tpu.memory_space<smem>>
    %20 = vector.broadcast %19 : f32 to vector<1x8xf32>
    %21 = arith.addf %18, %20 : vector<1x8xf32>
    %c0_17 = arith.constant 0 : index
    %c0_18 = arith.constant 0 : index
    %c0_19 = arith.constant 0 : index
    %22 = vector.load %arg8[%c0_17, %c0_18, %c0_19] : memref<1x1x8xf32, #tpu.memory_space<vmem>>, vector<1x1x8xf32>
    %23 = vector.shape_cast %22 : vector<1x1x8xf32> to vector<1x8xf32>
    %24 = vector.shape_cast %21 : vector<1x8xf32> to vector<1x1x8xf32>
    tpu.vector_store %arg8[%c0_17, %c0_18, %c0_19], %24 {strides = array<i32>} : memref<1x1x8xf32, #tpu.memory_space<vmem>>, vector<1x1x8xf32>,
    return
  }
  func.func @transform_0(%arg0: i32) -> (i32, i32) {
    %c0_i32 = arith.constant 0 : i32
    %c0_i32_0 = arith.constant 0 : i32
    return %arg0, %c0_i32 : i32, i32
  }
  func.func @transform_1(%arg0: i32) -> (i32, i32) {
    %c0_i32 = arith.constant 0 : i32
    %c0_i32_0 = arith.constant 0 : i32
    %c0_i32_1 = arith.constant 0 : i32
    return %c0_i32, %c0_i32_0 : i32, i32
  }
  func.func @transform_2(%arg0: i32) -> (i32, i32) {
    %c0_i32 = arith.constant 0 : i32
    %c0_i32_0 = arith.constant 0 : i32
    %c0_i32_1 = arith.constant 0 : i32
    return %c0_i32, %c0_i32_0 : i32, i32
  }
  func.func @transform_3(%arg0: i32) -> (i32, i32) {
    %c0_i32 = arith.constant 0 : i32
    %c0_i32_0 = arith.constant 0 : i32
    %c0_i32_1 = arith.constant 0 : i32
    return %c0_i32, %c0_i32_0 : i32, i32
  }
  func.func @transform_4(%arg0: i32) -> (i32, i32) {
    %c0_i32 = arith.constant 0 : i32
    %c0_i32_0 = arith.constant 0 : i32
    %c0_i32_1 = arith.constant 0 : i32
    return %c0_i32, %c0_i32_0 : i32, i32
  }
  func.func @transform_5(%arg0: i32) -> (i32, i32) {
    %c0_i32 = arith.constant 0 : i32
    %c0_i32_0 = arith.constant 0 : i32
    %c0_i32_1 = arith.constant 0 : i32
    return %c0_i32, %c0_i32_0 : i32, i32
  }
  func.func @transform_6(%arg0: i32) -> (i32, i32) {
    %c0_i32 = arith.constant 0 : i32
    %c0_i32_0 = arith.constant 0 : i32
    %c0_i32_1 = arith.constant 0 : i32
    return %c0_i32, %c0_i32_0 : i32, i32
  }
  func.func @transform_7(%arg0: i32) -> (i32, i32, i32) {
    %c0_i32 = arith.constant 0 : i32
    %c0_i32_0 = arith.constant 0 : i32
    %c0_i32_1 = arith.constant 0 : i32
    return %arg0, %c0_i32, %c0_i32_0 : i32, i32, i32
  }
}

</mosaic_0001>

<bundles_post_ra>
// kernel: critic_forward.1
= control target key start
LH: loop header
LB: loop body
LE: loop exit
PB: predicated region body
PF: predicated region fallthrough
CT: control target
= control target key end

     0   :  { %s362_s0 = inlined_call_operand.vmem [shape: f32[8,32], index: 0, kind: input, shape index: {}]   ;;  %s363_s1 = inlined_call_operand.vmem [shape: bf16[32,128], index: 1, kind: input, shape index: {}]   ;;  %s364_s2 = inlined_call_operand.vmem [shape: f32[1,128], index: 2, kind: input, shape index: {}]   ;;  %s365_s3 = inlined_call_operand.vmem [shape: bf16[128,128], index: 3, kind: input, shape index: {}]   ;;  %s366_s4 = inlined_call_operand.vmem [shape: f32[1,128], index: 4, kind: input, shape index: {}]   ;;  %s367_s5 = inlined_call_operand.vmem [shape: f32[1,128], index: 5, kind: input, shape index: {}]   ;;  %s368_s6 = inlined_call_operand.<no memory space> [shape: f32[1,1], index: 6, kind: input, shape index: {}]   ;;  %s369_s7 = inlined_call_operand.hbm [shape: f32[1,1,8], index: 7, kind: output, shape index: {}]  }
   0x1   :  { %v235_v0 = vld [vmem:[%s363_s1 + $0x8] sm:$0xff]  ;;  %v243_v1 = vld [vmem:[%s365_s3 + $0x38] sm:$0xff]  ;;  %v234_v2 = vld [vmem:[%s363_s1] sm:$0xff] }
   0x2   :  { %61 = vmatpush.bf16.msra.mxu0 %v235_v0  ;;  %v29_v3 = vld [vmem:[%s362_s0] sm:$0xff]  ;;  %138 = vmatpush.bf16.msra.mxu1 %v243_v1  ;;  %v242_v4 = vld [vmem:[%s365_s3 + $0x30] sm:$0xff] }
   0x3   :  { %13 = vsyncpa [#allocation4], 0  ;;  %v30_v5 = vpack.c.bf16 %v29_v3, %v29_v3  ;;  %vm51_vm0 = vcmask 261120   ;;  %v241_v6 = vld [vmem:[%s365_s3 + $0x28] sm:$0xff]  ;;  %v240_v7 = vld [vmem:[%s365_s3 + $0x20] sm:$0xff]  ;;  %v154_v24 = vstv %s368_s6  ;;  %s273_s27 = smov [#allocation3]  }
   0x4   :  { %v239_v8 = vld [vmem:[%s365_s3 + $0x18] sm:$0xff]  ;;  %v238_v9 = vld [vmem:[%s365_s3 + $0x10] sm:$0xff]  ;;  %v237_v10 = vld [vmem:[%s365_s3 + $0x8] sm:$0xff]  ;;  %s182_s28 = sshll.u32 %s273_s27, 4  ;;  %vm175_vm1 = vcmask 57344   ;;  %s183_s28 = int_to_ptr.vmem [resolvable:$true] %s182_s28 }
   0x5   :  { %v236_v11 = vld [vmem:[%s365_s3] sm:$0xff] }
   0x6   :  { %62 = vmatpush.bf16.msra.mxu0 %v234_v2  ;;  %139 = vmatpush.bf16.msra.mxu1 %v242_v4  ;;  %v245_v12 = vld [vmem:[%s364_s2] ss:$0 sm:$0xff] }
   0x7   :  { %v246_v18 = vld [vmem:[%s366_s4] ss:$0 sm:$0xff]  ;;  %s184_s4 = sshll.u32 %s369_s7, 4  ;;  %s185_s4 = int_to_ptr.hbm [resolvable:$true] %s184_s4 }
   0x8   :  { %v152_v22 = vld [vmem:[%s367_s5] sm:$0x1] }
   0x9   :  { %201 = vmatmul.msk.bf16.vlgmr.msra.gmra.mxu0 %vm51_vm0, %v30_v5 }
   0xa   :  { %140 = vmatpush.bf16.msra.mxu1 %v241_v6 }
   0xe   :  { %141 = vmatpush.bf16.msra.mxu1 %v240_v7 }
  0x12   :  { %142 = vmatpush.bf16.msra.mxu1 %v239_v8 }
  0x16   :  { %143 = vmatpush.bf16.msra.mxu1 %v238_v9 }
  0x1a   :  { %144 = vmatpush.bf16.msra.mxu1 %v237_v10 }
  0x1e   :  { %145 = vmatpush.bf16.msra.mxu1 %v236_v11 }
  0x86   :  { %v64_v13 = vpop.f32.mrf.mxu0 }
  0x87   :  { %v65_v14 = vadd.f32 %v245_v12, %v64_v13 }
  0x89   :  { %v68_v15 = vmax.f32 %v65_v14, 0.0 }
  0x8b   :  { %v69_v16 = vpack.c.bf16 %v68_v15, %v68_v15 }
  0x8d   :  { %146 = vmatmul.bf16.vlgmr.msra.gmra.mxu1 %v69_v16 }
  0x8e   :  { %v66_v17 = vpop.f32.mrf.mxu0 }
 0x10a   :  { %v147_v19 = vpop.f32.mrf.mxu1 }
 0x10b   :  { %v148_v20 = vadd.f32 %v246_v18, %v147_v19 }
 0x10d   :  { %v151_v21 = vmax.f32 %v148_v20, 0.0 }
 0x10f   :  { %170 = vmatpush.xpose.msra.mxu2 %v151_v21 }
 0x112   :  { %v149_v23 = vpop.f32.mrf.mxu1  ;;  %171 = vmatmul.f32.vlgmr.msra.gmra.mxu2 %v152_v22 }
 0x195   :  { %v172_v25 = vpop.f32.mrf.mxu2 }
 0x196   :  { %v173_v26 = vadd.f32 %v172_v25, %v154_v24 }
 0x198   :  { %176 = vst.msk [vmem:[#allocation3] sm:$0x1] %vm175_vm1, %v173_v26 }
 0x199   :  { %187 = dma.vmem_to_hbm [thread:$0]  %s183_s28, 16, %s185_s4, [#allocation4]  }
 0x19a   :  { %271 = dma.done.wait [#allocation4], 16  }
 0x19b   :  { %272 = vsyncadd [#allocation4], 4294967280 }
 0x19c   :  { %192 = vsyncpa [#allocation4], 1 }

</bundles_post_ra>
